<compile_context>
chip_gen: v7x
topology: tpu7x:2x2x1
jax: 0.10.0
libtpu: 0.0.40
codegen_flags: <defaults>
</compile_context>

<pallas_src>
import functools

import jax
import jax.numpy as jnp
from jax.experimental import pallas as pl
from jax.experimental.pallas import tpu as pltpu

EPS = 1e-5


# ----------------------------- Pallas kernel ------------------------------- #

def _resblock_kernel(x_ref, w1_ref, b1_ref, w2_ref, b2_ref, o_ref, *, img_rows):
    """Fully fused ResBlock for one block of lane-packed, row-stacked images.

    x_ref : (M, L)    activations (M = images_per_block * H), f32; residual stays in VMEM
    w*_ref: (3, L, L) banded 3x3 conv weights with BN scale folded in (bf16 or f32)
    b*_ref: (1, L)    per-lane BN bias, f32
    o_ref : (M, L)    output, f32
    """
    x = x_ref[...]
    M, L = x.shape
    cdt = w1_ref.dtype                                # MXU operand dtype

    # Per-image row index -> masks that implement the top/bottom "SAME" zero padding
    # (also prevents rolls from bleeding across image boundaries when M > img_rows).
    row = jax.lax.broadcasted_iota(jnp.int32, (M, L), 0) % img_rows
    not_top = row >= 1
    not_bot = row <= img_rows - 2

    def conv_bn(inp, w_ref, bias_ref):
        # Row shifts via sublane roll + mask (XLU/VPU), not matmuls.
        up = jnp.where(not_top, pltpu.roll(inp, shift=1, axis=0), 0.0)      # x[h-1]
        dn = jnp.where(not_bot, pltpu.roll(inp, shift=M - 1, axis=0), 0.0)  # x[h+1]
        # dy=0 tap initialises the accumulator; BN bias folded in (no zeros fill).
        acc = jnp.dot(up.astype(cdt), w_ref[0],
                      preferred_element_type=jnp.float32) + bias_ref[...]
        acc = acc + jnp.dot(inp.astype(cdt), w_ref[1],
                            preferred_element_type=jnp.float32)
        acc = acc + jnp.dot(dn.astype(cdt), w_ref[2],
                            preferred_element_type=jnp.float32)
        return acc

    y1 = jnp.maximum(conv_bn(x, w1_ref, b1_ref), 0.0)        # conv1+bn1+relu (never leaves VMEM)
    out = jnp.maximum(conv_bn(y1, w2_ref, b2_ref) + x, 0.0)  # conv2+bn2 + residual + relu
    o_ref[...] = out.astype(o_ref.dtype)


# --------------------------- weight / layout prep --------------------------- #

def _fold_bn(gamma, beta, mean, var):
    scale = gamma / jnp.sqrt(var + EPS)
    bias = beta - mean * scale
    return scale.astype(jnp.float32), bias.astype(jnp.float32)


def _banded_weight(w_hwio, scale, W, lane_pack, dtype):
    """Fold a 3x3 HWIO conv weight (+ per-output-channel BN scale) into three
    (L, L) banded matrices (one per dy tap), block-diagonal over lane-packed images:
        B_dy[(w+dx-1)*C + ci, w*C + co] = w[dy, dx, ci, co] * scale[co]
    Out-of-range (w+dx-1) blocks are absent -> 'SAME' zero padding left/right."""
    C = w_hwio.shape[2]
    wf = w_hwio.astype(jnp.float32) * scale[None, None, None, :]
    bands = []
    for dy in range(3):
        b = jnp.zeros((W * C, W * C), jnp.float32)
        for dx in range(3):
            b = b + jnp.kron(jnp.eye(W, k=1 - dx, dtype=jnp.float32), wf[dy, dx])
        if lane_pack > 1:
            b = jnp.kron(jnp.eye(lane_pack, dtype=jnp.float32), b)
        bands.append(b)
    return jnp.stack(bands, axis=0).astype(dtype)                # (3, L, L)


def _lane_pack_factor(WC, N):
    """Smallest k (dividing N, k<=8) so k*WC is a multiple of 128 -> unmasked stores."""
    if WC % 128 == 0:
        return 1
    for k in range(2, 9):
        if (k * WC) % 128 == 0 and N % k == 0:
            return k
    return 1


def _images_per_block(n_packed, H, target_rows=256, max_rows=2048):
    """Images per grid step: fill the MXU rows (B*H >= target) without blowing VMEM."""
    best = 1
    for b in range(1, n_packed + 1):
        if n_packed % b == 0 and b * H <= max_rows:
            best = b
            if b * H >= target_rows:
                break
    return best


def make_resblock_forward(params, x_shape, compute_dtype=jnp.bfloat16):
    """Build the fused ResBlock forward once (weights folded/banded at build time)."""
    N, C, H, W = x_shape
    WC = W * C
    k = _lane_pack_factor(WC, N)                 # images packed along lanes
    L = k * WC
    n_packed = N // k
    b_img = _images_per_block(n_packed, H)       # packed images per grid step
    if H % 8 != 0:                               # keep block shape legal for any H
        b_img = n_packed
    grid = (n_packed // b_img,)
    m_blk = b_img * H

    s1, c1 = _fold_bn(params["gamma1"], params["beta1"], params["mean1"], params["var1"])
    s2, c2 = _fold_bn(params["gamma2"], params["beta2"], params["mean2"], params["var2"])
    W1 = _banded_weight(params["w1"], s1, W, k, compute_dtype)    # conv1 * bn1-scale
    W2 = _banded_weight(params["w2"], s2, W, k, compute_dtype)    # conv2 * bn2-scale
    b1 = jnp.tile(c1, k * W).reshape(1, L).astype(jnp.float32)    # bn1 bias per lane
    b2 = jnp.tile(c2, k * W).reshape(1, L).astype(jnp.float32)    # bn2 bias per lane

    itemsize = jnp.dtype(compute_dtype).itemsize
    flops = int(12 * n_packed * H * L * L)                       # 2 convs * 3 taps * 2MNK
    bytes_accessed = int(4 * 2 * N * H * WC + itemsize * 2 * 3 * L * L + 4 * 2 * L)
    vmem_limit = int(min(max(2 * (2 * 3 * L * L * itemsize + 2 * m_blk * L * 4)
                             + (4 << 20), 16 << 20), 48 << 20))

    kernel = functools.partial(_resblock_kernel, img_rows=H)

    call = pl.pallas_call(
        kernel,
        out_shape=jax.ShapeDtypeStruct((n_packed * H, L), jnp.float32),
        grid=grid,
        in_specs=[
            pl.BlockSpec((m_blk, L), lambda g: (g, 0)),          # activations (lane-dense)
            pl.BlockSpec((3, L, L), lambda g: (0, 0, 0)),        # banded conv1 weights
            pl.BlockSpec((1, L), lambda g: (0, 0)),              # bn1 bias
            pl.BlockSpec((3, L, L), lambda g: (0, 0, 0)),        # banded conv2 weights
            pl.BlockSpec((1, L), lambda g: (0, 0)),              # bn2 bias
        ],
        out_specs=pl.BlockSpec((m_blk, L), lambda g: (g, 0)),
        compiler_params=pltpu.CompilerParams(
            dimension_semantics=("parallel",),
            vmem_limit_bytes=vmem_limit),
        cost_estimate=pl.CostEstimate(flops=flops, transcendentals=0,
                                      bytes_accessed=bytes_accessed),
    )

    def forward(x_nchw):
        # TODO(synk): the NCHW<->NHWC transposes are lane-sparse XLA ops around a
        # microseconds-scale kernel; accept NHWC / pre-packed input inside a full net.
        x = jnp.transpose(x_nchw, (0, 2, 3, 1)).reshape(N, H, WC).astype(jnp.float32)
        xp = (x.reshape(n_packed, k, H, WC)
               .transpose(0, 2, 1, 3)                             # pack k images on lanes
               .reshape(n_packed * H, L))
        out = call(xp, W1, b1, W2, b2)
        out = (out.reshape(n_packed, H, k, WC)
                  .transpose(0, 2, 1, 3)
                  .reshape(N, H, W, C))
        return jnp.transpose(out, (0, 3, 1, 2))                   # -> NCHW

    return jax.jit(forward)


# ---------------------------- pure-JAX reference ---------------------------- #

def _ref_forward(x_nchw, params):
    def conv(x, w_hwio):
        return jax.lax.conv_general_dilated(
            x, w_hwio, window_strides=(1, 1), padding="SAME",
            dimension_numbers=("NCHW", "HWIO", "NCHW"))

    def bn(x, g, b, m, v):
        g, b, m, v = (a.reshape(1, -1, 1, 1) for a in (g, b, m, v))
        return (x - m) / jnp.sqrt(v + EPS) * g + b

    out = jax.nn.relu(bn(conv(x_nchw, params["w1"]),
                         params["gamma1"], params["beta1"], params["mean1"], params["var1"]))
    out = bn(conv(out, params["w2"]),
             params["gamma2"], params["beta2"], params["mean2"], params["var2"])
    out = out + x_nchw
    return jax.nn.relu(out)


# ----------------------------------- main ----------------------------------- #

if __name__ == "__main__":
    planes = 4
    N, H, W = 2, 16, 16

    key = jax.random.PRNGKey(0)
    ks = jax.random.split(key, 11)

    # Deterministic synthetic parameters (conv weights stored HWIO = (3,3,Cin,Cout)).
    params = {
        "w1": 0.1 * jax.random.normal(ks[0], (3, 3, planes, planes), jnp.float32),
        "w2": 0.1 * jax.random.normal(ks[1], (3, 3, planes, planes), jnp.float32),
        "gamma1": 1.0 + 0.1 * jax.random.normal(ks[2], (planes,), jnp.float32),
        "beta1": 0.1 * jax.random.normal(ks[3], (planes,), jnp.float32),
        "mean1": 0.1 * jax.random.normal(ks[4], (planes,), jnp.float32),
        "var1": 1.0 + 0.1 * jnp.abs(jax.random.normal(ks[5], (planes,), jnp.float32)),
        "gamma2": 1.0 + 0.1 * jax.random.normal(ks[6], (planes,), jnp.float32),
        "beta2": 0.1 * jax.random.normal(ks[7], (planes,), jnp.float32),
        "mean2": 0.1 * jax.random.normal(ks[8], (planes,), jnp.float32),
        "var2": 1.0 + 0.1 * jnp.abs(jax.random.normal(ks[9], (planes,), jnp.float32)),
    }

    x = jax.random.normal(ks[10], (N, planes, H, W), jnp.float32)
    ref = jax.block_until_ready(_ref_forward(x, params))

    # Exactness check: f32 MXU operands (same algebra as the reference).
    fwd_f32 = make_resblock_forward(params, x.shape, compute_dtype=jnp.float32)
    out_f32 = jax.block_until_ready(fwd_f32(x))
    assert out_f32.shape == (N, planes, H, W)
    assert jnp.allclose(out_f32, ref, atol=1e-4, rtol=1e-4), \
        float(jnp.max(jnp.abs(out_f32 - ref)))

    # Performance configuration (v6e/v7x): bf16 MXU operands, f32 accumulation/epilogue.
    fwd_bf16 = make_resblock_forward(params, x.shape, compute_dtype=jnp.bfloat16)
    out_bf16 = jax.block_until_ready(fwd_bf16(x))
    assert out_bf16.shape == (N, planes, H, W)
    assert jnp.allclose(out_bf16, ref, atol=5e-2, rtol=5e-2), \
        float(jnp.max(jnp.abs(out_bf16 - ref)))

    print("KERNEL_OK")
</pallas_src>

<mosaic_0001>
module attributes {stable_mosaic.version = 11 : i64} {
  func.func @_resblock_kernel(%arg0: i32, %arg1: memref<16x128xf32, #tpu.memory_space<vmem>>, %arg2: memref<3x128x128xf32, #tpu.memory_space<vmem>>, %arg3: memref<1x128xf32, #tpu.memory_space<vmem>>, %arg4: memref<3x128x128xf32, #tpu.memory_space<vmem>>, %arg5: memref<1x128xf32, #tpu.memory_space<vmem>>, %arg6: memref<16x128xf32, #tpu.memory_space<vmem>>) attributes {dimension_semantics = [#tpu.dimension_semantics<parallel>], iteration_bounds = array<i64: 1>, scalar_prefetch = 0 : i64, scratch_operands = 0 : i64, tpu.core_type = #tpu.core_type<tc>, window_params = [{transform_indices = @transform_0, window_bounds = array<i64: 16, 128>}, {pipeline_mode = #tpu.pipeline_mode<synchronous>, transform_indices = @transform_1, window_bounds = array<i64: 3, 128, 128>}, {pipeline_mode = #tpu.pipeline_mode<synchronous>, transform_indices = @transform_2, window_bounds = array<i64: 1, 128>}, {pipeline_mode = #tpu.pipeline_mode<synchronous>, transform_indices = @transform_3, window_bounds = array<i64: 3, 128, 128>}, {pipeline_mode = #tpu.pipeline_mode<synchronous>, transform_indices = @transform_4, window_bounds = array<i64: 1, 128>}, {transform_indices = @transform_5, window_bounds = array<i64: 16, 128>}]} {
    %c0 = arith.constant 0 : index
    %c0_0 = arith.constant 0 : index
    %0 = vector.load %arg1[%c0, %c0_0] : memref<16x128xf32, #tpu.memory_space<vmem>>, vector<16x128xf32>
    %1 = tpu.iota {dimensions = array<i32: 0>} : vector<16x128xi32>
    %c16_i32 = arith.constant 16 : i32
    %c0_i32 = arith.constant 0 : i32
    %2 = arith.cmpi eq, %c16_i32, %c0_i32 : i32
    %c1_i32 = arith.constant 1 : i32
    %3 = arith.select %2, %c1_i32, %c16_i32 : i32
    %4 = vector.broadcast %3 : i32 to vector<16x128xi32>
    %5 = arith.remsi %1, %4 : vector<16x128xi32>
    %c0_i32_1 = arith.constant 0 : i32
    %6 = vector.broadcast %c0_i32_1 : i32 to vector<16x128xi32>
    %7 = arith.cmpi ne, %5, %6 : vector<16x128xi32>
    %c0_i32_2 = arith.constant 0 : i32
    %8 = vector.broadcast %c0_i32_2 : i32 to vector<16x128xi32>
    %9 = arith.cmpi slt, %5, %8 : vector<16x128xi32>
    %c0_i32_3 = arith.constant 0 : i32
    %10 = arith.cmpi slt, %3, %c0_i32_3 : i32
    %11 = vector.broadcast %10 : i1 to vector<16x128xi1>
    %12 = vector.broadcast %11 : vector<16x128xi1> to vector<16x128xi1>
    %13 = arith.xori %9, %12 : vector<16x128xi1>
    %14 = arith.andi %13, %7 : vector<16x128xi1>
    %15 = vector.broadcast %3 : i32 to vector<16x128xi32>
    %16 = arith.addi %5, %15 : vector<16x128xi32>
    %17 = arith.select %14, %16, %5 : vector<16x128xi1>, vector<16x128xi32>
    %c1_i32_4 = arith.constant 1 : i32
    %18 = vector.broadcast %c1_i32_4 : i32 to vector<16x128xi32>
    %19 = arith.cmpi sge, %17, %18 : vector<16x128xi32>
    %c14_i32 = arith.constant 14 : i32
    %20 = vector.broadcast %c14_i32 : i32 to vector<16x128xi32>
    %21 = arith.cmpi sle, %17, %20 : vector<16x128xi32>
    %c1_i32_5 = arith.constant 1 : i32
    %22 = tpu.dynamic_rotate %0 by %c1_i32_5 dim 0 : vector<16x128xf32>, i32 -> vector<16x128xf32>
    %cst = arith.constant 0.000000e+00 : f32
    %23 = vector.broadcast %cst : f32 to vector<16x128xf32>
    %24 = arith.select %19, %22, %23 : vector<16x128xi1>, vector<16x128xf32>
    %c15_i32 = arith.constant 15 : i32
    %25 = tpu.dynamic_rotate %0 by %c15_i32 dim 0 : vector<16x128xf32>, i32 -> vector<16x128xf32>
    %cst_6 = arith.constant 0.000000e+00 : f32
    %26 = vector.broadcast %cst_6 : f32 to vector<16x128xf32>
    %27 = arith.select %21, %25, %26 : vector<16x128xi1>, vector<16x128xf32>
    %c0_7 = arith.constant 0 : index
    %c0_8 = arith.constant 0 : index
    %c0_9 = arith.constant 0 : index
    %28 = vector.load %arg2[%c0_7, %c0_8, %c0_9] : memref<3x128x128xf32, #tpu.memory_space<vmem>>, vector<1x128x128xf32>
    %29 = vector.shape_cast %28 : vector<1x128x128xf32> to vector<128x128xf32>
    %cst_10 = arith.constant dense<0.000000e+00> : vector<16x128xf32>
    %30 = tpu.matmul %24, %29, %cst_10 {dimension_numbers = #tpu.dot_dimension_numbers<[1], [0], [0], [1], [0, 0, 1, 1], [], []>} : vector<16x128xf32>, vector<128x128xf32>, vector<16x128xf32> -> vector<16x128xf32>
    %c0_11 = arith.constant 0 : index
    %c0_12 = arith.constant 0 : index
    %31 = vector.load %arg3[%c0_11, %c0_12] : memref<1x128xf32, #tpu.memory_space<vmem>>, vector<1x128xf32>
    %32 = vector.broadcast %31 : vector<1x128xf32> to vector<16x128xf32>
    %33 = arith.addf %30, %32 : vector<16x128xf32>
    %c1 = arith.constant 1 : index
    %c0_13 = arith.constant 0 : index
    %c0_14 = arith.constant 0 : index
    %34 = vector.load %arg2[%c1, %c0_13, %c0_14] : memref<3x128x128xf32, #tpu.memory_space<vmem>>, vector<1x128x128xf32>
    %35 = vector.shape_cast %34 : vector<1x128x128xf32> to vector<128x128xf32>
    %cst_15 = arith.constant dense<0.000000e+00> : vector<16x128xf32>
    %36 = tpu.matmul %0, %35, %cst_15 {dimension_numbers = #tpu.dot_dimension_numbers<[1], [0], [0], [1], [0, 0, 1, 1], [], []>} : vector<16x128xf32>, vector<128x128xf32>, vector<16x128xf32> -> vector<16x128xf32>
    %37 = arith.addf %33, %36 : vector<16x128xf32>
    %c2 = arith.constant 2 : index
    %c0_16 = arith.constant 0 : index
    %c0_17 = arith.constant 0 : index
    %38 = vector.load %arg2[%c2, %c0_16, %c0_17] : memref<3x128x128xf32, #tpu.memory_space<vmem>>, vector<1x128x128xf32>
    %39 = vector.shape_cast %38 : vector<1x128x128xf32> to vector<128x128xf32>
    %cst_18 = arith.constant dense<0.000000e+00> : vector<16x128xf32>
    %40 = tpu.matmul %27, %39, %cst_18 {dimension_numbers = #tpu.dot_dimension_numbers<[1], [0], [0], [1], [0, 0, 1, 1], [], []>} : vector<16x128xf32>, vector<128x128xf32>, vector<16x128xf32> -> vector<16x128xf32>
    %41 = arith.addf %37, %40 : vector<16x128xf32>
    %cst_19 = arith.constant 0.000000e+00 : f32
    %42 = vector.broadcast %cst_19 : f32 to vector<16x128xf32>
    %43 = arith.maximumf %41, %42 : vector<16x128xf32>
    %c1_i32_20 = arith.constant 1 : i32
    %44 = tpu.dynamic_rotate %43 by %c1_i32_20 dim 0 : vector<16x128xf32>, i32 -> vector<16x128xf32>
    %cst_21 = arith.constant 0.000000e+00 : f32
    %45 = vector.broadcast %cst_21 : f32 to vector<16x128xf32>
    %46 = arith.select %19, %44, %45 : vector<16x128xi1>, vector<16x128xf32>
    %c15_i32_22 = arith.constant 15 : i32
    %47 = tpu.dynamic_rotate %43 by %c15_i32_22 dim 0 : vector<16x128xf32>, i32 -> vector<16x128xf32>
    %cst_23 = arith.constant 0.000000e+00 : f32
    %48 = vector.broadcast %cst_23 : f32 to vector<16x128xf32>
    %49 = arith.select %21, %47, %48 : vector<16x128xi1>, vector<16x128xf32>
    %c0_24 = arith.constant 0 : index
    %c0_25 = arith.constant 0 : index
    %c0_26 = arith.constant 0 : index
    %50 = vector.load %arg4[%c0_24, %c0_25, %c0_26] : memref<3x128x128xf32, #tpu.memory_space<vmem>>, vector<1x128x128xf32>
    %51 = vector.shape_cast %50 : vector<1x128x128xf32> to vector<128x128xf32>
    %cst_27 = arith.constant dense<0.000000e+00> : vector<16x128xf32>
    %52 = tpu.matmul %46, %51, %cst_27 {dimension_numbers = #tpu.dot_dimension_numbers<[1], [0], [0], [1], [0, 0, 1, 1], [], []>} : vector<16x128xf32>, vector<128x128xf32>, vector<16x128xf32> -> vector<16x128xf32>
    %c0_28 = arith.constant 0 : index
    %c0_29 = arith.constant 0 : index
    %53 = vector.load %arg5[%c0_28, %c0_29] : memref<1x128xf32, #tpu.memory_space<vmem>>, vector<1x128xf32>
    %54 = vector.broadcast %53 : vector<1x128xf32> to vector<16x128xf32>
    %55 = arith.addf %52, %54 : vector<16x128xf32>
    %c1_30 = arith.constant 1 : index
    %c0_31 = arith.constant 0 : index
    %c0_32 = arith.constant 0 : index
    %56 = vector.load %arg4[%c1_30, %c0_31, %c0_32] : memref<3x128x128xf32, #tpu.memory_space<vmem>>, vector<1x128x128xf32>
    %57 = vector.shape_cast %56 : vector<1x128x128xf32> to vector<128x128xf32>
    %cst_33 = arith.constant dense<0.000000e+00> : vector<16x128xf32>
    %58 = tpu.matmul %43, %57, %cst_33 {dimension_numbers = #tpu.dot_dimension_numbers<[1], [0], [0], [1], [0, 0, 1, 1], [], []>} : vector<16x128xf32>, vector<128x128xf32>, vector<16x128xf32> -> vector<16x128xf32>
    %59 = arith.addf %55, %58 : vector<16x128xf32>
    %c2_34 = arith.constant 2 : index
    %c0_35 = arith.constant 0 : index
    %c0_36 = arith.constant 0 : index
    %60 = vector.load %arg4[%c2_34, %c0_35, %c0_36] : memref<3x128x128xf32, #tpu.memory_space<vmem>>, vector<1x128x128xf32>
    %61 = vector.shape_cast %60 : vector<1x128x128xf32> to vector<128x128xf32>
    %cst_37 = arith.constant dense<0.000000e+00> : vector<16x128xf32>
    %62 = tpu.matmul %49, %61, %cst_37 {dimension_numbers = #tpu.dot_dimension_numbers<[1], [0], [0], [1], [0, 0, 1, 1], [], []>} : vector<16x128xf32>, vector<128x128xf32>, vector<16x128xf32> -> vector<16x128xf32>
    %63 = arith.addf %59, %62 : vector<16x128xf32>
    %64 = arith.addf %63, %0 : vector<16x128xf32>
    %cst_38 = arith.constant 0.000000e+00 : f32
    %65 = vector.broadcast %cst_38 : f32 to vector<16x128xf32>
    %66 = arith.maximumf %64, %65 : vector<16x128xf32>
    %c0_39 = arith.constant 0 : index
    %c0_40 = arith.constant 0 : index
    %67 = vector.load %arg6[%c0_39, %c0_40] : memref<16x128xf32, #tpu.memory_space<vmem>>, vector<16x128xf32>
    tpu.vector_store %arg6[%c0_39, %c0_40], %66 {strides = array<i32>} : memref<16x128xf32, #tpu.memory_space<vmem>>, vector<16x128xf32>,
    return
  }
  func.func @transform_0(%arg0: i32) -> (i32, i32) {
    %c0_i32 = arith.constant 0 : i32
    %c0_i32_0 = arith.constant 0 : i32
    return %arg0, %c0_i32 : i32, i32
  }
  func.func @transform_1(%arg0: i32) -> (i32, i32, i32) {
    %c0_i32 = arith.constant 0 : i32
    %c0_i32_0 = arith.constant 0 : i32
    %c0_i32_1 = arith.constant 0 : i32
    %c0_i32_2 = arith.constant 0 : i32
    return %c0_i32, %c0_i32_0, %c0_i32_1 : i32, i32, i32
  }
  func.func @transform_2(%arg0: i32) -> (i32, i32) {
    %c0_i32 = arith.constant 0 : i32
    %c0_i32_0 = arith.constant 0 : i32
    %c0_i32_1 = arith.constant 0 : i32
    return %c0_i32, %c0_i32_0 : i32, i32
  }
  func.func @transform_3(%arg0: i32) -> (i32, i32, i32) {
    %c0_i32 = arith.constant 0 : i32
    %c0_i32_0 = arith.constant 0 : i32
    %c0_i32_1 = arith.constant 0 : i32
    %c0_i32_2 = arith.constant 0 : i32
    return %c0_i32, %c0_i32_0, %c0_i32_1 : i32, i32, i32
  }
  func.func @transform_4(%arg0: i32) -> (i32, i32) {
    %c0_i32 = arith.constant 0 : i32
    %c0_i32_0 = arith.constant 0 : i32
    %c0_i32_1 = arith.constant 0 : i32
    return %c0_i32, %c0_i32_0 : i32, i32
  }
  func.func @transform_5(%arg0: i32) -> (i32, i32) {
    %c0_i32 = arith.constant 0 : i32
    %c0_i32_0 = arith.constant 0 : i32
    return %arg0, %c0_i32 : i32, i32
  }
}

</mosaic_0001>

<bundles_post_ra>
// kernel: forward.1
= control target key start
LH: loop header
LB: loop body
LE: loop exit
PB: predicated region body
PF: predicated region fallthrough
CT: control target
= control target key end

     0   :  { %10 = vsyncpa [#allocation3], 0  ;;  %s1265_s18 = smov [#allocation2]   ;;  %s1525_s0 = inlined_call_operand.vmem [shape: f32[16,128], index: 0, kind: input, shape index: {}]   ;;  %s1526_s1 = inlined_call_operand.hbm [shape: f32[3,128,128], index: 1, kind: input, shape index: {}]   ;;  %s1527_s2 = inlined_call_operand.vmem [shape: f32[1,128], index: 2, kind: input, shape index: {}]   ;;  %s1528_s3 = inlined_call_operand.vmem [shape: f32[3,128,128], index: 3, kind: input, shape index: {}]   ;;  %s1529_s4 = inlined_call_operand.vmem [shape: f32[1,128], index: 4, kind: input, shape index: {}]   ;;  %s1530_s5 = inlined_call_operand.vmem [shape: f32[16,128], index: 5, kind: output, shape index: {}]  }
   0x1   :  { %s18_s19 = sshll.u32 %s1265_s18, 4  ;;  %s1241_s22 = scalar_lea.hbm %s1526_s1, 6144  ;;  %s19_s19 = int_to_ptr.vmem [resolvable:$true] %s18_s19 }
   0x2   :  { %p1242_p0 = scmp.ne.s32.totalorder %s1526_s1, %s1241_s22  ;;  %p1245_p1 = scmp.lt.u32.totalorder %s1241_s22, %s1526_s1 }
   0x4   :  { %p1247_p2 = pnand %p1245_p1, %p1242_p0 }
   0x6   :  { %1250 = shalt.err (!%p1247_p2)
}
   0x7   :  { %s1251_s27 = scalar_lea.vmem %s19_s19, 6144  ;;  %p1256_p4 = scmp.lt.s32.totalorder %s19_s19, %s19_s19 }
   0x8   :  { %p1252_p3 = scmp.ne.s32.totalorder %s19_s19, %s1251_s27  ;;  %p1257_p5 = scmp.lt.s32.totalorder %s1251_s27, %s1251_s27 }
   0xa   :  { %p1258_p6 = por %p1257_p5, %p1256_p4 }
   0xc   :  { %p1259_p7 = pnand %p1258_p6, %p1252_p3 }
   0xe   :  { %1262 = shalt.err (!%p1259_p7)
}
   0xf   :  { %s1266_s28 = smov 128   ;;  %s1267_s29 = smov 8  }
  0x10   :  { %24 = dma.hbm_to_vmem [thread:$0]  %s1526_s1, 6144, %s19_s19, [#allocation3], %s1266_s28, %s1266_s28, %s1267_s29  }
  0x11   :  { %1263 = dma.done.wait [#allocation3], 6144  }
  0x12   :  { %1264 = vsyncadd [#allocation3], 4294961152  ;;  %v36_v0 = vlaneseq  ;;  %v81_v2 = vld [vmem:[#allocation2] sm:$0xff]  ;;  %v82_v3 = vld [vmem:[#allocation2 + $0x8] sm:$0xff] }
  0x13   :  { %v83_v4 = vld [vmem:[#allocation2 + $0x10] sm:$0xff]  ;;  %v1034_v5 = vpack.c.bf16 %v82_v3, %v81_v2  ;;  %v84_v6 = vld [vmem:[#allocation2 + $0x18] sm:$0xff]  ;;  %v85_v8 = vld [vmem:[#allocation2 + $0x20] sm:$0xff] }
  0x14   :  { %v1310_v1 = vshrl.u32 %v36_v0, 7  ;;  %v1038_v7 = vpack.c.bf16 %v84_v6, %v83_v4  ;;  %v86_v9 = vld [vmem:[#allocation2 + $0x28] sm:$0xff]  ;;  %v1316_v12 = vld [vmem:[%s1525_s0] sm:$0xff]  ;;  %v87_v14 = vld [vmem:[#allocation2 + $0x30] sm:$0xff] }
  0x15   :  { %1035 = vmatprep.subr.bf16.mxu0 %v1034_v5  ;;  %v1042_v11 = vpack.c.bf16 %v86_v9, %v85_v8  ;;  %v1321_v13 = vld [vmem:[%s1525_s0 + $0x8] sm:$0xff]  ;;  %v88_v15 = vld [vmem:[#allocation2 + $0x38] sm:$0xff]  ;;  %v67_v17 = vrot.slane %v1316_v12, 7  ;;  %v89_v21 = vld [vmem:[#allocation2 + $0x40] sm:$0xff] }
  0x16   :  { %v43_v10 = vand.u32 15, %v1310_v1  ;;  %1037 = vmatpush3.bf16.msra.mxu0 %v1034_v5  ;;  %vm69_vm0 = vcmp.lt.s32.totalorder %v1310_v1, 1  ;;  %v68_v18 = vrot.slane %v1321_v13, 7  ;;  %v1046_v20 = vpack.c.bf16 %v88_v15, %v87_v14  ;;  %v90_v22 = vld [vmem:[#allocation2 + $0x48] sm:$0xff]  ;;  %v91_v24 = vld [vmem:[#allocation2 + $0x50] sm:$0xff]  ;;  %v92_v25 = vld [vmem:[#allocation2 + $0x58] sm:$0xff] }
  0x17   :  { %1039 = vmatprep.subr.bf16.mxu0 %v1038_v7  ;;  %v1050_v23 = vpack.c.bf16 %v90_v22, %v89_v21  ;;  %v381_v26 = vld [vmem:[%s1528_s3] sm:$0xff]  ;;  %v1054_v27 = vpack.c.bf16 %v92_v25, %v91_v24  ;;  %v382_v28 = vld [vmem:[%s1528_s3 + $0x8] sm:$0xff]  ;;  %v383_v29 = vld [vmem:[%s1528_s3 + $0x10] sm:$0xff]  ;;  %vm76_vm2 = vcmp.lt.s32.totalorder %v1310_v1, 7 }
  0x18   :  { %vm1324_vm1 = vcmp.ge.s32.totalorder %v43_v10, 1  ;;  %v71_v19 = vsel %vm69_vm0, %v68_v18, %v67_v17  ;;  %v384_v30 = vld [vmem:[%s1528_s3 + $0x18] sm:$0xff]  ;;  %v93_v31 = vld [vmem:[#allocation2 + $0x60] sm:$0xff]  ;;  %v94_v32 = vld [vmem:[#allocation2 + $0x68] sm:$0xff]  ;;  %v1130_v33 = vpack.c.bf16 %v382_v28, %v381_v26  ;;  %v70_v55 = vsel %vm69_vm0, %v67_v17, %v68_v18 }
  0x19   :  { %856 = vmatprep.mubr.msk.f32.mxu0 %vm1324_vm1, %v71_v19  ;;  %v1134_v34 = vpack.c.bf16 %v384_v30, %v383_v29  ;;  %v385_v35 = vld [vmem:[%s1528_s3 + $0x20] sm:$0xff]  ;;  %v386_v36 = vld [vmem:[%s1528_s3 + $0x28] sm:$0xff]  ;;  %v1058_v37 = vpack.c.bf16 %v94_v32, %v93_v31  ;;  %v95_v38 = vld [vmem:[#allocation2 + $0x70] sm:$0xff]  ;;  %v74_v19 = vrot.slane %v1316_v12, 1 }
  0x1a   :  { %1041 = vmatpush3.bf16.msra.mxu0 %v1038_v7  ;;  %1131 = vmatprep.subr.bf16.mxu1 %v1130_v33  ;;  %v96_v39 = vld [vmem:[#allocation2 + $0x78] sm:$0xff]  ;;  %v1138_v40 = vpack.c.bf16 %v386_v36, %v385_v35  ;;  %v387_v41 = vld [vmem:[%s1528_s3 + $0x30] sm:$0xff]  ;;  %v180_v44 = vld [vmem:[#allocation2 + $0x80] sm:$0xff] }
  0x1b   :  { %1043 = vmatprep.subr.bf16.mxu0 %v1042_v11  ;;  %1133 = vmatpush3.bf16.msra.mxu1 %v1130_v33  ;;  %v388_v42 = vld [vmem:[%s1528_s3 + $0x38] sm:$0xff]  ;;  %v1062_v43 = vpack.c.bf16 %v96_v39, %v95_v38  ;;  %v181_v45 = vld [vmem:[#allocation2 + $0x88] sm:$0xff]  ;;  %v389_v47 = vld [vmem:[%s1528_s3 + $0x40] sm:$0xff] }
  0x1c   :  { %1135 = vmatprep.subr.bf16.mxu1 %v1134_v34  ;;  %v1142_v46 = vpack.c.bf16 %v388_v42, %v387_v41  ;;  %v390_v48 = vld [vmem:[%s1528_s3 + $0x48] sm:$0xff]  ;;  %v1066_v49 = vpack.c.bf16 %v181_v45, %v180_v44  ;;  %v182_v50 = vld [vmem:[#allocation2 + $0x90] sm:$0xff]  ;;  %v183_v51 = vld [vmem:[#allocation2 + $0x98] sm:$0xff]  ;;  %v38_v42 = vadd.s32 8, %v1310_v1 }
  0x1d   :  { %v1146_v52 = vpack.c.bf16 %v390_v48, %v389_v47  ;;  %v391_v53 = vld [vmem:[%s1528_s3 + $0x50] sm:$0xff]  ;;  %v392_v54 = vld [vmem:[%s1528_s3 + $0x58] sm:$0xff]  ;;  %v1070_v56 = vpack.c.bf16 %v183_v51, %v182_v50  ;;  %v184_v57 = vld [vmem:[#allocation2 + $0xa0] sm:$0xff] }
  0x1e   :  { %1045 = vmatpush3.bf16.msra.mxu0 %v1042_v11  ;;  %v185_v58 = vld [vmem:[#allocation2 + $0xa8] sm:$0xff]  ;;  %v1150_v59 = vpack.c.bf16 %v392_v54, %v391_v53  ;;  %v186_v61 = vld [vmem:[#allocation2 + $0xb0] sm:$0xff]  ;;  %v187_v62 = vld [vmem:[#allocation2 + $0xb8] sm:$0xff]  ;;  %v50_v44 = vand.u32 15, %v38_v42 }
  0x1f   :  { %1047 = vmatprep.subr.bf16.mxu0 %v1046_v20  ;;  %1137 = vmatpush3.bf16.msra.mxu1 %v1134_v34  ;;  %v1074_v60 = vpack.c.bf16 %v185_v58, %v184_v57  ;;  %v1078_v63 = vpack.c.bf16 %v187_v62, %v186_v61  ;;  %v188_v0 = vld [vmem:[#allocation2 + $0xc0] sm:$0xff]  ;;  %v189_v2 = vld [vmem:[#allocation2 + $0xc8] sm:$0xff]  ;;  %v190_v4 = vld [vmem:[#allocation2 + $0xd0] sm:$0xff] }
  0x20   :  { %1139 = vmatprep.subr.bf16.mxu1 %v1138_v40  ;;  %v1082_v3 = vpack.c.bf16 %v189_v2, %v188_v0  ;;  %v191_v5 = vld [vmem:[#allocation2 + $0xd8] sm:$0xff]  ;;  %v192_v7 = vld [vmem:[#allocation2 + $0xe0] sm:$0xff]  ;;  %v193_v8 = vld [vmem:[#allocation2 + $0xe8] sm:$0xff]  ;;  %vm1380_vm3 = vcmp.le.s32.totalorder %v50_v44, 14 }
  0x21   :  { %v1086_v6 = vpack.c.bf16 %v191_v5, %v190_v4  ;;  %v1090_v9 = vpack.c.bf16 %v193_v8, %v192_v7  ;;  %v194_v10 = vld [vmem:[#allocation2 + $0xf0] sm:$0xff]  ;;  %v195_v11 = vld [vmem:[#allocation2 + $0xf8] sm:$0xff]  ;;  %v274_v15 = vld [vmem:[#allocation2 + $0x100] sm:$0xff] }
  0x22   :  { %1049 = vmatpush3.bf16.msra.mxu0 %v1046_v20  ;;  %v1094_v14 = vpack.c.bf16 %v195_v11, %v194_v10  ;;  %v275_v17 = vld [vmem:[#allocation2 + $0x108] sm:$0xff]  ;;  %v75_v20 = vrot.slane %v1321_v13, 1  ;;  %v276_v21 = vld [vmem:[#allocation2 + $0x110] sm:$0xff]  ;;  %v277_v22 = vld [vmem:[#allocation2 + $0x118] sm:$0xff] }
  0x23   :  { %1051 = vmatprep.subr.bf16.mxu0 %v1050_v23  ;;  %1141 = vmatpush3.bf16.msra.mxu1 %v1138_v40  ;;  %v1098_v18 = vpack.c.bf16 %v275_v17, %v274_v15  ;;  %v278_v25 = vld [vmem:[#allocation2 + $0x120] sm:$0xff]  ;;  %v279_v26 = vld [vmem:[#allocation2 + $0x128] sm:$0xff]  ;;  %v280_v28 = vld [vmem:[#allocation2 + $0x130] sm:$0xff] }
  0x24   :  { %1143 = vmatprep.subr.bf16.mxu1 %v1142_v46  ;;  %v77_v24 = vsel %vm76_vm2, %v74_v19, %v75_v20  ;;  %v281_v29 = vld [vmem:[#allocation2 + $0x138] sm:$0xff]  ;;  %v282_v31 = vld [vmem:[#allocation2 + $0x140] sm:$0xff]  ;;  %v283_v32 = vld [vmem:[#allocation2 + $0x148] sm:$0xff] }
  0x25   :  { %v1110_v30 = vpack.c.bf16 %v281_v29, %v280_v28  ;;  %v1114_v33 = vpack.c.bf16 %v283_v32, %v282_v31  ;;  %v284_v34 = vld [vmem:[#allocation2 + $0x150] sm:$0xff]  ;;  %v285_v35 = vld [vmem:[#allocation2 + $0x158] sm:$0xff]  ;;  %v287_v38 = vld [vmem:[#allocation2 + $0x168] sm:$0xff] }
  0x26   :  { %1053 = vmatpush3.bf16.msra.mxu0 %v1050_v23  ;;  %v1102_v23 = vpack.c.bf16 %v277_v22, %v276_v21  ;;  %v1118_v36 = vpack.c.bf16 %v285_v35, %v284_v34  ;;  %v288_v40 = vld [vmem:[#allocation2 + $0x170] sm:$0xff]  ;;  %v289_v41 = vld [vmem:[#allocation2 + $0x178] sm:$0xff]  ;;  %v393_v47 = vld [vmem:[%s1528_s3 + $0x60] sm:$0xff] }
  0x27   :  { %1055 = vmatprep.subr.bf16.mxu0 %v1054_v27  ;;  %1145 = vmatpush3.bf16.msra.mxu1 %v1142_v46  ;;  %v78_v46 = vsel %vm76_vm2, %v75_v20, %v74_v19  ;;  %v394_v48 = vld [vmem:[%s1528_s3 + $0x68] sm:$0xff]  ;;  %v395_v50 = vld [vmem:[%s1528_s3 + $0x70] sm:$0xff]  ;;  %v396_v51 = vld [vmem:[%s1528_s3 + $0x78] sm:$0xff] }
  0x28   :  { %1147 = vmatprep.subr.bf16.mxu1 %v1146_v52  ;;  %v683_v53 = vld [vmem:[%s1528_s3 + $0x80] sm:$0xff]  ;;  %v684_v54 = vld [vmem:[%s1528_s3 + $0x88] sm:$0xff]  ;;  %v686_v0 = vld [vmem:[%s1528_s3 + $0x98] sm:$0xff] }
  0x29   :  { %v687_v11 = vld [vmem:[%s1528_s3 + $0xa0] sm:$0xff]  ;;  %v689_v1 = vld [vmem:[%s1528_s3 + $0xb0] sm:$0xff]  ;;  %v690_v16 = vld [vmem:[%s1528_s3 + $0xb8] sm:$0xff] }
  0x2a   :  { %1057 = vmatpush3.bf16.msra.mxu0 %v1054_v27  ;;  %v1106_v27 = vpack.c.bf16 %v279_v26, %v278_v25  ;;  %v1174_v17 = vpack.c.bf16 %v690_v16, %v689_v1  ;;  %v692_v19 = vld [vmem:[%s1528_s3 + $0xc8] sm:$0xff]  ;;  %v693_v21 = vld [vmem:[%s1528_s3 + $0xd0] sm:$0xff]  ;;  %v694_v22 = vld [vmem:[%s1528_s3 + $0xd8] sm:$0xff] }
  0x2b   :  { %1059 = vmatprep.subr.bf16.mxu0 %v1058_v37  ;;  %1149 = vmatpush3.bf16.msra.mxu1 %v1146_v52  ;;  %v1158_v52 = vpack.c.bf16 %v396_v51, %v395_v50  ;;  %v696_v25 = vld [vmem:[%s1528_s3 + $0xe8] sm:$0xff]  ;;  %v698_v28 = vld [vmem:[%s1528_s3 + $0xf8] sm:$0xff]  ;;  %v707_v42 = vld [vmem:[%s1528_s3 + $0x140] sm:$0xff] }
  0x2c   :  { %1151 = vmatprep.subr.bf16.mxu1 %v1150_v59  ;;  %v700_v31 = vld [vmem:[%s1528_s3 + $0x108] sm:$0xff]  ;;  %v702_v34 = vld [vmem:[%s1528_s3 + $0x118] sm:$0xff] }
  0x2d   :  { %v712_v50 = vld [vmem:[%s1528_s3 + $0x168] sm:$0xff] }
  0x2e   :  { %1061 = vmatpush3.bf16.msra.mxu0 %v1058_v37  ;;  %v286_v37 = vld [vmem:[#allocation2 + $0x160] sm:$0xff] }
  0x2f   :  { %1063 = vmatprep.subr.bf16.mxu0 %v1062_v43  ;;  %1153 = vmatpush3.bf16.msra.mxu1 %v1150_v59  ;;  %v1122_v39 = vpack.c.bf16 %v287_v38, %v286_v37  ;;  %v704_v37 = vld [vmem:[%s1528_s3 + $0x128] sm:$0xff] }
  0x32   :  { %1065 = vmatpush3.bf16.msra.mxu0 %v1062_v43  ;;  %v1126_v43 = vpack.c.bf16 %v289_v41, %v288_v40  ;;  %v706_v40 = vld [vmem:[%s1528_s3 + $0x138] sm:$0xff] }
  0x33   :  { %1067 = vmatprep.subr.bf16.mxu0 %v1066_v49 }
  0x35   :  { %857 = vmatmul.mubr.f32.vlgmr.msra.gmra.mrb[0].mxu0 %v70_v55  ;;  %v1162_v55 = vpack.c.bf16 %v684_v54, %v683_v53  ;;  %v714_v53 = vld [vmem:[%s1528_s3 + $0x178] sm:$0xff] }
  0x36   :  { %1069 = vmatpush3.bf16.msra.mxu0 %v1066_v49  ;;  %891 = vmatprep.mubr.f32.mxu0 %v1316_v12  ;;  %v1154_v49 = vpack.c.bf16 %v394_v48, %v393_v47  ;;  %v710_v47 = vld [vmem:[%s1528_s3 + $0x158] sm:$0xff] }
  0x37   :  { %1071 = vmatprep.subr.bf16.mxu0 %v1070_v56 }
  0x38   :  { %1155 = vmatprep.subr.bf16.mxu1 %v1154_v49 }
  0x39   :  { %1157 = vmatpush3.bf16.msra.mxu1 %v1154_v49  ;;  %v711_v49 = vld [vmem:[%s1528_s3 + $0x160] sm:$0xff] }
  0x3a   :  { %1073 = vmatpush3.bf16.msra.mxu0 %v1070_v56  ;;  %1159 = vmatprep.subr.bf16.mxu1 %v1158_v52  ;;  %v678_v56 = vld [vmem:[%s1527_s2] ss:$0 sm:$0xff]  ;;  %v1218_v51 = vpack.c.bf16 %v712_v50, %v711_v49 }
  0x3b   :  { %1075 = vmatprep.subr.bf16.mxu0 %v1074_v60 }
  0x3d   :  { %1161 = vmatpush3.bf16.msra.mxu1 %v1158_v52  ;;  %v713_v52 = vld [vmem:[%s1528_s3 + $0x170] sm:$0xff] }
  0x3e   :  { %1077 = vmatpush3.bf16.msra.mxu0 %v1074_v60  ;;  %1163 = vmatprep.subr.bf16.mxu1 %v1162_v55  ;;  %v1222_v54 = vpack.c.bf16 %v714_v53, %v713_v52 }
  0x3f   :  { %1079 = vmatprep.subr.bf16.mxu0 %v1078_v63 }
  0x42   :  { %1081 = vmatpush3.bf16.msra.mxu0 %v1078_v63  ;;  %v685_v63 = vld [vmem:[%s1528_s3 + $0x90] sm:$0xff] }
  0x43   :  { %1083 = vmatprep.subr.bf16.mxu0 %v1082_v3 }
  0x46   :  { %1085 = vmatpush3.bf16.msra.mxu0 %v1082_v3 }
  0x47   :  { %1087 = vmatprep.subr.bf16.mxu0 %v1086_v6 }
  0x4a   :  { %1089 = vmatpush3.bf16.msra.mxu0 %v1086_v6  ;;  %v1166_v6 = vpack.c.bf16 %v686_v0, %v685_v63 }
  0x4b   :  { %1091 = vmatprep.subr.bf16.mxu0 %v1090_v9 }
  0x4e   :  { %1093 = vmatpush3.bf16.msra.mxu0 %v1090_v9 }
  0x4f   :  { %1095 = vmatprep.subr.bf16.mxu0 %v1094_v14 }
  0x52   :  { %1097 = vmatpush3.bf16.msra.mxu0 %v1094_v14  ;;  %v688_v14 = vld [vmem:[%s1528_s3 + $0xa8] sm:$0xff] }
  0x53   :  { %1099 = vmatprep.subr.bf16.mxu0 %v1098_v18  ;;  %v1170_v15 = vpack.c.bf16 %v688_v14, %v687_v11 }
  0x55   :  { %892 = vmatmul.mubr.f32.vlgmr.msra.gmra.mrb[0].mxu0 %v1321_v13 }
  0x56   :  { %1101 = vmatpush3.bf16.msra.mxu0 %v1098_v18  ;;  %926 = vmatprep.mubr.f32.mxu0 %v77_v24  ;;  %v691_v18 = vld [vmem:[%s1528_s3 + $0xc0] sm:$0xff] }
  0x57   :  { %1103 = vmatprep.subr.bf16.mxu0 %v1102_v23  ;;  %v1178_v20 = vpack.c.bf16 %v692_v19, %v691_v18  ;;  %v695_v24 = vld [vmem:[%s1528_s3 + $0xe0] sm:$0xff] }
  0x58   :  { %v1186_v26 = vpack.c.bf16 %v696_v25, %v695_v24 }
  0x5a   :  { %1105 = vmatpush3.bf16.msra.mxu0 %v1102_v23  ;;  %v1182_v23 = vpack.c.bf16 %v694_v22, %v693_v21 }
  0x5b   :  { %1107 = vmatprep.subr.bf16.mxu0 %v1106_v27 }
  0x5e   :  { %1109 = vmatpush3.bf16.msra.mxu0 %v1106_v27  ;;  %v697_v27 = vld [vmem:[%s1528_s3 + $0xf0] sm:$0xff] }
  0x5f   :  { %1111 = vmatprep.subr.bf16.mxu0 %v1110_v30  ;;  %v1190_v29 = vpack.c.bf16 %v698_v28, %v697_v27 }
  0x62   :  { %1113 = vmatpush3.bf16.msra.mxu0 %v1110_v30  ;;  %v699_v30 = vld [vmem:[%s1528_s3 + $0x100] sm:$0xff] }
  0x63   :  { %1115 = vmatprep.subr.bf16.mxu0 %v1114_v33  ;;  %v1194_v32 = vpack.c.bf16 %v700_v31, %v699_v30 }
  0x66   :  { %1117 = vmatpush3.bf16.msra.mxu0 %v1114_v33  ;;  %v701_v33 = vld [vmem:[%s1528_s3 + $0x110] sm:$0xff] }
  0x67   :  { %1119 = vmatprep.subr.bf16.mxu0 %v1118_v36  ;;  %v1198_v35 = vpack.c.bf16 %v702_v34, %v701_v33 }
  0x6a   :  { %1121 = vmatpush3.bf16.msra.mxu0 %v1118_v36  ;;  %v703_v36 = vld [vmem:[%s1528_s3 + $0x120] sm:$0xff] }
  0x6b   :  { %1123 = vmatprep.subr.bf16.mxu0 %v1122_v39  ;;  %v1202_v38 = vpack.c.bf16 %v704_v37, %v703_v36 }
  0x6e   :  { %1125 = vmatpush3.bf16.msra.mxu0 %v1122_v39  ;;  %v705_v39 = vld [vmem:[%s1528_s3 + $0x130] sm:$0xff] }
  0x6f   :  { %1127 = vmatprep.subr.bf16.mxu0 %v1126_v43  ;;  %v1206_v41 = vpack.c.bf16 %v706_v40, %v705_v39 }
  0x72   :  { %1129 = vmatpush3.bf16.msra.mxu0 %v1126_v43  ;;  %v708_v43 = vld [vmem:[%s1528_s3 + $0x148] sm:$0xff] }
  0x73   :  { %v1210_v44 = vpack.c.bf16 %v708_v43, %v707_v42 }
  0x75   :  { %927 = vmatmul.mubr.msk.f32.vlgmr.msra.gmra.mrb[0].mxu0 %vm1380_vm3, %v78_v46  ;;  %v709_v46 = vld [vmem:[%s1528_s3 + $0x150] sm:$0xff] }
  0x76   :  { %v1214_v48 = vpack.c.bf16 %v710_v47, %v709_v46 }
 0x148   :  { %v928_v57 = vpop.f32.mrb[0].mxu0 }
 0x149   :  { %v1226_v58 = vadd.f32 %v928_v57, %v678_v56  ;;  %v356_v59 = vpop.f32.mrb[1].mxu0 }
 0x14a   :  { %v1227_v60 = vadd.f32 %v678_v56, %v356_v59 }
 0x14b   :  { %v368_v61 = vmax.f32 %v1226_v58, 0.0 }
 0x14c   :  { %v367_v62 = vmax.f32 %v1227_v60, 0.0 }
 0x14d   :  { %v376_v2 = vrot.slane %v368_v61, 1  ;;  %v370_v3 = vrot.slane %v368_v61, 7 }
 0x14e   :  { %v375_v4 = vrot.slane %v367_v62, 1  ;;  %v369_v5 = vrot.slane %v367_v62, 7 }
 0x150   :  { %v372_v7 = vsel %vm69_vm0, %v370_v3, %v369_v5  ;;  %v371_v8 = vsel %vm69_vm0, %v369_v5, %v370_v3  ;;  %v377_v9 = vsel %vm76_vm2, %v375_v4, %v376_v2  ;;  %v1423_v10 = vsel %vm76_vm2, %v376_v2, %v375_v4 }
 0x151   :  { %961 = vmatprep.mubr.msk.f32.mxu1 %vm1324_vm1, %v372_v7 }
 0x152   :  { %962 = vmatmul.mubr.f32.vlgmr.msra.gmra.mrb[0].mxu1 %v371_v8 }
 0x153   :  { %1165 = vmatpush3.bf16.msra.mxu1 %v1162_v55  ;;  %996 = vmatprep.mubr.f32.mxu1 %v367_v62  ;;  %v681_v55 = vld [vmem:[%s1529_s4] ss:$0 sm:$0xff] }
 0x154   :  { %1167 = vmatprep.subr.bf16.mxu1 %v1166_v6 }
 0x157   :  { %1169 = vmatpush3.bf16.msra.mxu1 %v1166_v6 }
 0x158   :  { %1171 = vmatprep.subr.bf16.mxu1 %v1170_v15 }
 0x15b   :  { %1173 = vmatpush3.bf16.msra.mxu1 %v1170_v15 }
 0x15c   :  { %1175 = vmatprep.subr.bf16.mxu1 %v1174_v17 }
 0x15f   :  { %1177 = vmatpush3.bf16.msra.mxu1 %v1174_v17 }
 0x160   :  { %1179 = vmatprep.subr.bf16.mxu1 %v1178_v20 }
 0x163   :  { %1181 = vmatpush3.bf16.msra.mxu1 %v1178_v20 }
 0x164   :  { %1183 = vmatprep.subr.bf16.mxu1 %v1182_v23 }
 0x167   :  { %1185 = vmatpush3.bf16.msra.mxu1 %v1182_v23 }
 0x168   :  { %1187 = vmatprep.subr.bf16.mxu1 %v1186_v26 }
 0x16b   :  { %1189 = vmatpush3.bf16.msra.mxu1 %v1186_v26 }
 0x16c   :  { %1191 = vmatprep.subr.bf16.mxu1 %v1190_v29 }
 0x16f   :  { %1193 = vmatpush3.bf16.msra.mxu1 %v1190_v29 }
 0x170   :  { %1195 = vmatprep.subr.bf16.mxu1 %v1194_v32 }
 0x172   :  { %997 = vmatmul.mubr.f32.vlgmr.msra.gmra.mrb[0].mxu1 %v368_v61 }
 0x173   :  { %1197 = vmatpush3.bf16.msra.mxu1 %v1194_v32  ;;  %1031 = vmatprep.mubr.f32.mxu1 %v377_v9 }
 0x174   :  { %1199 = vmatprep.subr.bf16.mxu1 %v1198_v35 }
 0x177   :  { %1201 = vmatpush3.bf16.msra.mxu1 %v1198_v35 }
 0x178   :  { %1203 = vmatprep.subr.bf16.mxu1 %v1202_v38 }
 0x17b   :  { %1205 = vmatpush3.bf16.msra.mxu1 %v1202_v38 }
 0x17c   :  { %1207 = vmatprep.subr.bf16.mxu1 %v1206_v41 }
 0x17f   :  { %1209 = vmatpush3.bf16.msra.mxu1 %v1206_v41 }
 0x180   :  { %1211 = vmatprep.subr.bf16.mxu1 %v1210_v44 }
 0x183   :  { %1213 = vmatpush3.bf16.msra.mxu1 %v1210_v44 }
 0x184   :  { %1215 = vmatprep.subr.bf16.mxu1 %v1214_v48 }
 0x187   :  { %1217 = vmatpush3.bf16.msra.mxu1 %v1214_v48 }
 0x188   :  { %1219 = vmatprep.subr.bf16.mxu1 %v1218_v51 }
 0x18b   :  { %1221 = vmatpush3.bf16.msra.mxu1 %v1218_v51 }
 0x18c   :  { %1223 = vmatprep.subr.bf16.mxu1 %v1222_v54 }
 0x18f   :  { %1225 = vmatpush3.bf16.msra.mxu1 %v1222_v54 }
 0x192   :  { %1032 = vmatmul.mubr.msk.f32.vlgmr.msra.gmra.mrb[0].mxu1 %vm1380_vm3, %v1423_v10 }
 0x265   :  { %v1033_v56 = vpop.f32.mrb[0].mxu1 }
 0x266   :  { %v1228_v57 = vadd.f32 %v1033_v56, %v681_v55  ;;  %v656_v58 = vpop.f32.mrb[1].mxu1 }
 0x267   :  { %v1229_v59 = vadd.f32 %v681_v55, %v656_v58 }
 0x268   :  { %v668_v60 = vadd.f32 %v1228_v57, %v1321_v13 }
 0x269   :  { %v667_v61 = vadd.f32 %v1229_v59, %v1316_v12 }
 0x26a   :  { %v670_v62 = vmax.f32 %v668_v60, 0.0 }
 0x26b   :  { %v669_v63 = vmax.f32 %v667_v61, 0.0 }
 0x26c   :  { %672 = vst [vmem:[%s1530_s5 + $0x8] sm:$0xff] %v670_v62 }
 0x26d   :  { %671 = vst [vmem:[%s1530_s5] sm:$0xff] %v669_v63 }
 0x26e   :  { %677 = vsyncpa [#allocation3], 1 }

</bundles_post_ra>
